<compile_context>
chip_gen: v7x
topology: tpu7x:2x2x1
jax: 0.10.0
libtpu: 0.0.40
codegen_flags: <defaults>
</compile_context>

<pallas_src>
import functools

import jax
import jax.numpy as jnp
from jax.experimental import pallas as pl
from jax.experimental.pallas import tpu as pltpu


def _round_up(x, m):
    return ((x + m - 1) // m) * m


def _sublayer_connection_kernel(seed_ref, x_full_ref, x_res_ref, gamma_ref,
                                beta_ref, w_ref, b_ref, o_ref, normed_ref, *,
                                eps, dropout_p, training, mxu_dtype):
    """Fused LayerNorm (unbiased std) -> dense sublayer -> dropout -> residual.

    Grid is (row_tiles, n_tiles); j tiles the weight's output dimension.
    LayerNorm runs once per row tile (at j == 0) into a VMEM scratch.
    """
    j = pl.program_id(1)

    # --- LayerNorm (torch semantics), once per row tile ---
    @pl.when(j == 0)
    def _():
        x = x_full_ref[...].astype(jnp.float32)               # (TR, D)
        d = x.shape[-1]
        mean = jnp.mean(x, axis=-1, keepdims=True)
        xc = x - mean
        var_unbiased = jnp.sum(xc * xc, axis=-1, keepdims=True) * (1.0 / (d - 1))
        std = jnp.sqrt(var_unbiased)
        # EUP reciprocal instead of a full (TR, D) VALU divide.
        inv = pl.reciprocal(std + eps, approx=True)            # (TR, 1)
        normed_ref[...] = (gamma_ref[...] * inv) * xc + beta_ref[...]

    # --- sublayer: dense projection on the MXU (bf16 operands, f32 acc) ---
    normed = normed_ref[...].astype(mxu_dtype)
    y = jnp.dot(normed, w_ref[...], preferred_element_type=jnp.float32)
    y = y + b_ref[...]

    # --- dropout (training only; eval mode is identity like nn.Dropout) ---
    if training and dropout_p > 0.0:
        pltpu.prng_seed(seed_ref[0]
                        + pl.program_id(0) * pl.num_programs(1)
                        + pl.program_id(1))
        bits = pltpu.bitcast(pltpu.prng_random_bits(y.shape), jnp.uint32)
        thresh = jnp.uint32(min(int(round(dropout_p * (2.0 ** 32))), 2 ** 32 - 1))
        keep = bits >= thresh                                   # P(keep) = 1 - p
        y = jnp.where(keep, y * (1.0 / (1.0 - dropout_p)), 0.0)

    # --- residual add ---
    o_ref[...] = (x_res_ref[...].astype(jnp.float32) + y).astype(o_ref.dtype)


def sublayer_connection(x, gamma, beta, w, b, *, eps=1e-6, dropout_p=0.0,
                        training=False, seed=0, block_rows=256, block_n=512,
                        mxu_dtype=jnp.bfloat16):
    """x: (B, S, D); gamma/beta/b: (D,); w: (D, D)."""
    B, S, D = x.shape
    rows = B * S
    itemsize = jnp.dtype(x.dtype).itemsize

    # Sublane packing minimum for the row tile (8 for f32, 16 for bf16).
    min_rows = max(8, 32 // itemsize)
    block_rows = min(block_rows, _round_up(rows, min_rows))
    block_rows = _round_up(block_rows, min_rows)
    padded_rows = _round_up(rows, block_rows)

    # N (output-feature) tiling: only kicks in when the D x D weight is large
    # (keeps the resident W slice at D*block_n, important for v7x 64 MiB VMEM).
    if block_n >= D or D % block_n != 0 or block_n % 128 != 0:
        block_n = D
    n_tiles = D // block_n

    x2 = x.reshape(rows, D)
    if padded_rows != rows:
        x2 = jnp.pad(x2, ((0, padded_rows - rows), (0, 0)))

    gamma2 = gamma.reshape(1, D).astype(jnp.float32)
    beta2 = beta.reshape(1, D).astype(jnp.float32)
    b2 = b.reshape(1, D).astype(jnp.float32)
    w_lo = w.astype(mxu_dtype)            # low-precision weights: half the DMA
    seed_arr = jnp.array([seed], dtype=jnp.int32)

    kernel = functools.partial(
        _sublayer_connection_kernel,
        eps=eps, dropout_p=dropout_p, training=training, mxu_dtype=mxu_dtype)

    cost = pl.CostEstimate(
        flops=2 * padded_rows * D * D + 10 * padded_rows * D,
        transcendentals=2 * padded_rows,
        bytes_accessed=(3 * padded_rows * D * itemsize
                        + D * D * jnp.dtype(mxu_dtype).itemsize),
    )

    out = pl.pallas_call(
        kernel,
        out_shape=jax.ShapeDtypeStruct((padded_rows, D), x.dtype),
        grid_spec=pltpu.PrefetchScalarGridSpec(
            num_scalar_prefetch=1,                        # dropout seed in SMEM
            grid=(padded_rows // block_rows, n_tiles),
            in_specs=[
                # full row block for LayerNorm (block index constant over j,
                # so it is not re-DMA'd between N tiles)
                pl.BlockSpec((block_rows, D), lambda i, j, seed: (i, 0)),
                # N-tile of the same rows for the residual add
                pl.BlockSpec((block_rows, block_n), lambda i, j, seed: (i, j)),
                pl.BlockSpec((1, D), lambda i, j, seed: (0, 0)),        # gamma
                pl.BlockSpec((1, D), lambda i, j, seed: (0, 0)),        # beta
                pl.BlockSpec((D, block_n), lambda i, j, seed: (0, j)),  # W
                pl.BlockSpec((1, block_n), lambda i, j, seed: (0, j)),  # bias
            ],
            out_specs=pl.BlockSpec((block_rows, block_n),
                                   lambda i, j, seed: (i, j)),
            scratch_shapes=[pltpu.VMEM((block_rows, D), jnp.float32)],
        ),
        compiler_params=pltpu.CompilerParams(
            dimension_semantics=("parallel", "arbitrary"),
            vmem_limit_bytes=32 * 1024 * 1024),
        cost_estimate=cost,
    )(seed_arr, x2, x2, gamma2, beta2, w_lo, b2)

    return out[:rows].reshape(B, S, D)


def _reference(x, gamma, beta, w, b, eps=1e-6, mxu_dtype=jnp.bfloat16):
    """Pure-JAX reference of the eval-mode forward (dropout = identity),
    mirroring the kernel's low-precision MXU operands."""
    mean = jnp.mean(x, axis=-1, keepdims=True)
    std = jnp.std(x, axis=-1, keepdims=True, ddof=1)      # torch unbiased std
    normed = gamma * (x - mean) / (std + eps) + beta
    y = jnp.dot(normed.astype(mxu_dtype).astype(jnp.float32),
                w.astype(mxu_dtype).astype(jnp.float32)) + b
    return x + y


if __name__ == "__main__":
    B, S, D = 2, 8, 128
    key = jax.random.PRNGKey(0)
    kx, kw, kb = jax.random.split(key, 3)

    x = jax.random.normal(kx, (B, S, D), dtype=jnp.float32)

    # LayerNorm params initialized exactly as in the PyTorch module __init__.
    gamma = jnp.ones((D,), dtype=jnp.float32)    # a_2
    beta = jnp.zeros((D,), dtype=jnp.float32)    # b_2

    # Deterministic synthetic sublayer (dense projection) parameters.
    w = jax.random.normal(kw, (D, D), dtype=jnp.float32) * 0.02
    b = jax.random.normal(kb, (D,), dtype=jnp.float32) * 0.02

    # Eval mode (dropout identity) -> deterministic, checkable result.
    out = sublayer_connection(x, gamma, beta, w, b, eps=1e-6,
                              dropout_p=0.1, training=False)
    out = jax.block_until_ready(out)

    ref = _reference(x, gamma, beta, w, b, eps=1e-6, mxu_dtype=jnp.bfloat16)
    assert out.shape == (B, S, D)
    assert jnp.allclose(out, ref, atol=1e-2, rtol=1e-2), "mismatch vs reference"

    print("KERNEL_OK")
</pallas_src>

<mosaic_0001>
module attributes {stable_mosaic.version = 11 : i64} {
  func.func @_sublayer_connection_kernel(%arg0: i32, %arg1: i32, %arg2: memref<1xi32, #tpu.memory_space<smem>>, %arg3: memref<16x128xf32, #tpu.memory_space<vmem>>, %arg4: memref<16x128xf32, #tpu.memory_space<vmem>>, %arg5: memref<1x128xf32, #tpu.memory_space<vmem>>, %arg6: memref<1x128xf32, #tpu.memory_space<vmem>>, %arg7: memref<128x128xbf16, #tpu.memory_space<vmem>>, %arg8: memref<1x128xf32, #tpu.memory_space<vmem>>, %arg9: memref<16x128xf32, #tpu.memory_space<vmem>>, %arg10: memref<16x128xf32, #tpu.memory_space<vmem>>) attributes {dimension_semantics = [#tpu.dimension_semantics<parallel>, #tpu.dimension_semantics<arbitrary>], iteration_bounds = array<i64: 1, 1>, scalar_prefetch = 1 : i64, scratch_operands = 1 : i64, tpu.core_type = #tpu.core_type<tc>, window_params = [{transform_indices = @transform_0, window_bounds = array<i64: 16, 128>}, {transform_indices = @transform_1, window_bounds = array<i64: 16, 128>}, {pipeline_mode = #tpu.pipeline_mode<synchronous>, transform_indices = @transform_2, window_bounds = array<i64: 1, 128>}, {pipeline_mode = #tpu.pipeline_mode<synchronous>, transform_indices = @transform_3, window_bounds = array<i64: 1, 128>}, {transform_indices = @transform_4, window_bounds = array<i64: 128, 128>}, {transform_indices = @transform_5, window_bounds = array<i64: 1, 128>}, {transform_indices = @transform_6, window_bounds = array<i64: 16, 128>}]} {
    %c0_i32 = arith.constant 0 : i32
    %0 = arith.cmpi eq, %arg1, %c0_i32 : i32
    %1 = arith.extui %0 : i1 to i32
    %c0_i32_0 = arith.constant 0 : i32
    %2 = arith.cmpi ne, %1, %c0_i32_0 : i32
    scf.if %2 {
      %c0_10 = arith.constant 0 : index
      %c0_11 = arith.constant 0 : index
      %13 = vector.load %arg3[%c0_10, %c0_11] : memref<16x128xf32, #tpu.memory_space<vmem>>, vector<16x128xf32>
      %cst_12 = arith.constant dense<0.000000e+00> : vector<16xf32>
      %14 = vector.multi_reduction <add>, %13, %cst_12 [1] : vector<16x128xf32> to vector<16xf32>
      %15 = vector.shape_cast %14 : vector<16xf32> to vector<16x1xf32>
      %cst_13 = arith.constant 1.280000e+02 : f32
      %16 = vector.broadcast %cst_13 : f32 to vector<16x1xf32>
      %17 = arith.divf %15, %16 : vector<16x1xf32>
      %18 = vector.broadcast %17 : vector<16x1xf32> to vector<16x128xf32>
      %19 = arith.subf %13, %18 : vector<16x128xf32>
      %20 = arith.mulf %19, %19 : vector<16x128xf32>
      %cst_14 = arith.constant dense<0.000000e+00> : vector<16xf32>
      %21 = vector.multi_reduction <add>, %20, %cst_14 [1] : vector<16x128xf32> to vector<16xf32>
      %22 = vector.shape_cast %21 : vector<16xf32> to vector<16x1xf32>
      %cst_15 = arith.constant 0.00787401571 : f32
      %23 = vector.broadcast %cst_15 : f32 to vector<16x1xf32>
      %24 = arith.mulf %22, %23 : vector<16x1xf32>
      %25 = math.sqrt %24 : vector<16x1xf32>
      %cst_16 = arith.constant 9.99999997E-7 : f32
      %26 = vector.broadcast %cst_16 : f32 to vector<16x1xf32>
      %27 = arith.addf %25, %26 : vector<16x1xf32>
      %28 = tpu.reciprocal %27 {approx = true} : vector<16x1xf32> -> vector<16x1xf32>
      %c0_17 = arith.constant 0 : index
      %c0_18 = arith.constant 0 : index
      %29 = vector.load %arg5[%c0_17, %c0_18] : memref<1x128xf32, #tpu.memory_space<vmem>>, vector<1x128xf32>
      %30 = vector.broadcast %29 : vector<1x128xf32> to vector<16x128xf32>
      %31 = vector.broadcast %28 : vector<16x1xf32> to vector<16x128xf32>
      %32 = arith.mulf %30, %31 : vector<16x128xf32>
      %33 = arith.mulf %32, %19 : vector<16x128xf32>
      %c0_19 = arith.constant 0 : index
      %c0_20 = arith.constant 0 : index
      %34 = vector.load %arg6[%c0_19, %c0_20] : memref<1x128xf32, #tpu.memory_space<vmem>>, vector<1x128xf32>
      %35 = vector.broadcast %34 : vector<1x128xf32> to vector<16x128xf32>
      %36 = arith.addf %33, %35 : vector<16x128xf32>
      %c0_21 = arith.constant 0 : index
      %c0_22 = arith.constant 0 : index
      %37 = vector.load %arg10[%c0_21, %c0_22] : memref<16x128xf32, #tpu.memory_space<vmem>>, vector<16x128xf32>
      tpu.vector_store %arg10[%c0_21, %c0_22], %36 {strides = array<i32>} : memref<16x128xf32, #tpu.memory_space<vmem>>, vector<16x128xf32>,
    } else {
    }
    %c0 = arith.constant 0 : index
    %c0_1 = arith.constant 0 : index
    %3 = vector.load %arg10[%c0, %c0_1] : memref<16x128xf32, #tpu.memory_space<vmem>>, vector<16x128xf32>
    %4 = arith.truncf %3 : vector<16x128xf32> to vector<16x128xbf16>
    %c0_2 = arith.constant 0 : index
    %c0_3 = arith.constant 0 : index
    %5 = vector.load %arg7[%c0_2, %c0_3] : memref<128x128xbf16, #tpu.memory_space<vmem>>, vector<128x128xbf16>
    %cst = arith.constant dense<0.000000e+00> : vector<16x128xf32>
    %6 = tpu.matmul %4, %5, %cst {dimension_numbers = #tpu.dot_dimension_numbers<[1], [0], [0], [1], [0, 0, 1, 1], [], []>} : vector<16x128xbf16>, vector<128x128xbf16>, vector<16x128xf32> -> vector<16x128xf32>
    %c0_4 = arith.constant 0 : index
    %c0_5 = arith.constant 0 : index
    %7 = vector.load %arg8[%c0_4, %c0_5] : memref<1x128xf32, #tpu.memory_space<vmem>>, vector<1x128xf32>
    %8 = vector.broadcast %7 : vector<1x128xf32> to vector<16x128xf32>
    %9 = arith.addf %6, %8 : vector<16x128xf32>
    %c0_6 = arith.constant 0 : index
    %c0_7 = arith.constant 0 : index
    %10 = vector.load %arg4[%c0_6, %c0_7] : memref<16x128xf32, #tpu.memory_space<vmem>>, vector<16x128xf32>
    %11 = arith.addf %10, %9 : vector<16x128xf32>
    %c0_8 = arith.constant 0 : index
    %c0_9 = arith.constant 0 : index
    %12 = vector.load %arg9[%c0_8, %c0_9] : memref<16x128xf32, #tpu.memory_space<vmem>>, vector<16x128xf32>
    tpu.vector_store %arg9[%c0_8, %c0_9], %11 {strides = array<i32>} : memref<16x128xf32, #tpu.memory_space<vmem>>, vector<16x128xf32>,
    return
  }
  func.func @transform_0(%arg0: i32, %arg1: i32, %arg2: memref<1xi32, #tpu.memory_space<smem>>) -> (i32, i32) {
    %c0_i32 = arith.constant 0 : i32
    %c0_i32_0 = arith.constant 0 : i32
    return %arg0, %c0_i32 : i32, i32
  }
  func.func @transform_1(%arg0: i32, %arg1: i32, %arg2: memref<1xi32, #tpu.memory_space<smem>>) -> (i32, i32) {
    %c0_i32 = arith.constant 0 : i32
    return %arg0, %arg1 : i32, i32
  }
  func.func @transform_2(%arg0: i32, %arg1: i32, %arg2: memref<1xi32, #tpu.memory_space<smem>>) -> (i32, i32) {
    %c0_i32 = arith.constant 0 : i32
    %c0_i32_0 = arith.constant 0 : i32
    %c0_i32_1 = arith.constant 0 : i32
    return %c0_i32, %c0_i32_0 : i32, i32
  }
  func.func @transform_3(%arg0: i32, %arg1: i32, %arg2: memref<1xi32, #tpu.memory_space<smem>>) -> (i32, i32) {
    %c0_i32 = arith.constant 0 : i32
    %c0_i32_0 = arith.constant 0 : i32
    %c0_i32_1 = arith.constant 0 : i32
    return %c0_i32, %c0_i32_0 : i32, i32
  }
  func.func @transform_4(%arg0: i32, %arg1: i32, %arg2: memref<1xi32, #tpu.memory_space<smem>>) -> (i32, i32) {
    %c0_i32 = arith.constant 0 : i32
    %c0_i32_0 = arith.constant 0 : i32
    return %c0_i32, %arg1 : i32, i32
  }
  func.func @transform_5(%arg0: i32, %arg1: i32, %arg2: memref<1xi32, #tpu.memory_space<smem>>) -> (i32, i32) {
    %c0_i32 = arith.constant 0 : i32
    %c0_i32_0 = arith.constant 0 : i32
    return %c0_i32, %arg1 : i32, i32
  }
  func.func @transform_6(%arg0: i32, %arg1: i32, %arg2: memref<1xi32, #tpu.memory_space<smem>>) -> (i32, i32) {
    %c0_i32 = arith.constant 0 : i32
    return %arg0, %arg1 : i32, i32
  }
}

</mosaic_0001>

<bundles_post_ra>
// kernel: tpu_custom_call.1
= control target key start
LH: loop header
LB: loop body
LE: loop exit
PB: predicated region body
PF: predicated region fallthrough
CT: control target
= control target key end

     0   :  { %13 = vsyncpa [#allocation6], 0  ;;  %s558_s0 = inlined_call_operand.<no memory space> [shape: s32[1], index: 0, kind: input, shape index: {}]   ;;  %s559_s1 = inlined_call_operand.hbm [shape: f32[16,128], index: 1, kind: input, shape index: {}]   ;;  %s560_s2 = inlined_call_operand.hbm [shape: f32[16,128], index: 2, kind: input, shape index: {}]   ;;  %s561_s3 = inlined_call_operand.vmem [shape: f32[1,128], index: 3, kind: input, shape index: {}]   ;;  %s562_s4 = inlined_call_operand.vmem [shape: f32[1,128], index: 4, kind: input, shape index: {}]   ;;  %s563_s5 = inlined_call_operand.hbm [shape: bf16[128,128], index: 5, kind: input, shape index: {}]   ;;  %s564_s6 = inlined_call_operand.vmem [shape: f32[1,128], index: 6, kind: input, shape index: {}]   ;;  %s565_s7 = inlined_call_operand.hbm [shape: f32[16,128], index: 7, kind: output, shape index: {}]  }
   0x1   :  { %14 = vsyncpa [#allocation9], 0 }
   0x2   :  { %15 = vsyncpa [#allocation7], 0  ;;  %s430_s23 = smov [#allocation8]   ;;  %s431_s25 = smov [#allocation5]  }
   0x3   :  { %s33_s24 = sshll.u32 %s430_s23, 4  ;;  %s21_s26 = sshll.u32 %s431_s25, 4  ;;  %s34_s24 = int_to_ptr.vmem [resolvable:$true] %s33_s24  ;;  %s480_s26 = int_to_ptr.vmem [resolvable:$true] %s21_s26 }
   0x4   :  { %s336_s29 = scalar_lea.hbm %s560_s2, 256 }
   0x5   :  { %p337_p0 = scmp.ne.s32.totalorder %s560_s2, %s336_s29  ;;  %p340_p1 = scmp.lt.u32.totalorder %s336_s29, %s560_s2 }
   0x7   :  { %p342_p2 = pnand %p340_p1, %p337_p0 }
   0x9   :  { %345 = shalt.err (!%p342_p2)
}
   0xa   :  { %s346_s11 = scalar_lea.vmem %s34_s24, 256  ;;  %p351_p4 = scmp.lt.s32.totalorder %s34_s24, %s34_s24 }
   0xb   :  { %p347_p3 = scmp.ne.s32.totalorder %s34_s24, %s346_s11  ;;  %p352_p5 = scmp.lt.s32.totalorder %s346_s11, %s346_s11 }
   0xd   :  { %p353_p6 = por %p352_p5, %p351_p4 }
   0xf   :  { %p354_p7 = pnand %p353_p6, %p347_p3 }
  0x11   :  { %357 = shalt.err (!%p354_p7)
}
  0x12   :  { %s432_s12 = smov 128   ;;  %s433_s13 = smov 8  }
  0x13   :  { %39 = dma.hbm_to_vmem [thread:$0]  %s560_s2, 256, %s34_s24, [#allocation9], %s432_s12, %s432_s12, %s433_s13  }
  0x14   :  { %s358_s18 = scalar_lea.hbm %s559_s1, 256 }
  0x15   :  { %p359_p8 = scmp.ne.s32.totalorder %s559_s1, %s358_s18  ;;  %p362_p9 = scmp.lt.u32.totalorder %s358_s18, %s559_s1 }
  0x17   :  { %p364_p10 = pnand %p362_p9, %p359_p8 }
  0x19   :  { %367 = shalt.err (!%p364_p10)
}
  0x1a   :  { %s368_s0 = scalar_lea.vmem %s480_s26, 256  ;;  %p373_p12 = scmp.lt.s32.totalorder %s480_s26, %s480_s26 }
  0x1b   :  { %p369_p11 = scmp.ne.s32.totalorder %s480_s26, %s368_s0  ;;  %p374_p13 = scmp.lt.s32.totalorder %s368_s0, %s368_s0 }
  0x1d   :  { %p375_p0 = por %p374_p13, %p373_p12 }
  0x1f   :  { %p376_p1 = pnand %p375_p0, %p369_p11 }
  0x21   :  { %379 = shalt.err (!%p376_p1)
}
  0x22   :  { %27 = dma.hbm_to_vmem [thread:$0]  %s559_s1, 256, %s480_s26, [#allocation6], %s432_s12, %s432_s12, %s433_s13  }
  0x23   :  { %s434_s24 = smov [#allocation10]   ;;  %s380_s29 = scalar_lea.hbm %s563_s5, 1024 }
  0x24   :  { %s49_s25 = sshll.u32 %s434_s24, 4  ;;  %p381_p2 = scmp.ne.s32.totalorder %s563_s5, %s380_s29  ;;  %s50_s25 = int_to_ptr.vmem [resolvable:$true] %s49_s25 }
  0x25   :  { %p384_p3 = scmp.lt.u32.totalorder %s380_s29, %s563_s5 }
  0x27   :  { %p386_p4 = pnand %p384_p3, %p381_p2 }
  0x29   :  { %389 = shalt.err (!%p386_p4)
}
  0x2a   :  { %s390_s11 = scalar_lea.vmem %s50_s25, 1024  ;;  %p395_p6 = scmp.lt.s32.totalorder %s50_s25, %s50_s25 }
  0x2b   :  { %p391_p5 = scmp.ne.s32.totalorder %s50_s25, %s390_s11  ;;  %p396_p7 = scmp.lt.s32.totalorder %s390_s11, %s390_s11 }
  0x2d   :  { %p397_p8 = por %p396_p7, %p395_p6 }
  0x2f   :  { %p398_p9 = pnand %p397_p8, %p391_p5 }
  0x31   :  { %401 = shalt.err (!%p398_p9)
}
  0x32   :  { %s435_s1 = smov 64   ;;  %s436_s26 = smov 4  }
  0x33   :  { %55 = dma.hbm_to_vmem [thread:$0]  %s563_s5, 1024, %s50_s25, [#allocation9], %s435_s1, %s435_s1, %s436_s26  }
  0x34   :  { %424 = dma.done.wait [#allocation6], 256  }
  0x35   :  { %425 = vsyncadd [#allocation6], 4294967040 }
  0x36   :  { %426 = dma.done.wait [#allocation9], 1280  }
  0x37   :  { %427 = vsyncadd [#allocation9], 4294966016  ;;  %v72_v0 = vld [vmem:[#allocation5] sm:$0xff]  ;;  %v73_v1 = vld [vmem:[#allocation5 + $0x8] sm:$0xff]  ;;  %v437_v11 = vmov 0.0   ;;  %vm438_vm0 = vmmov 0  }
  0x38   :  { %74 = vadd.xlane.f32.xlu0 %v72_v0  ;;  %v320_v10 = vld [vmem:[#allocation10] sm:$0xff]   ;;  %290 = vmatprep.subr.bf16.mxu0 %v437_v11  ;;  %v321_v12 = vld [vmem:[#allocation10 + $0x8] sm:$0xff]   ;;  %v322_v13 = vld [vmem:[#allocation10 + $0x10] sm:$0xff]  }
  0x39   :  { %291 = vmatpush3.bf16.msra.mxu0 %v320_v10  ;;  %v323_v14 = vld [vmem:[#allocation10 + $0x18] sm:$0xff]   ;;  %v324_v15 = vld [vmem:[#allocation10 + $0x20] sm:$0xff]   ;;  %306 = vmatprep.mubr.msk.bf16.mxu0 %vm438_vm0, %v437_v11  ;;  %v325_v16 = vld [vmem:[#allocation10 + $0x28] sm:$0xff]  }
  0x3a   :  { %292 = vmatprep.subr.bf16.mxu0 %v437_v11  ;;  %v326_v17 = vld [vmem:[#allocation10 + $0x30] sm:$0xff]   ;;  %v327_v18 = vld [vmem:[#allocation10 + $0x38] sm:$0xff]   ;;  %v270_v35 = vld [vmem:[%s561_s3] ss:$0 sm:$0xff]  ;;  %s439_s3 = smov [#allocation11]  }
  0x3b   :  { %v271_v41 = vld [vmem:[%s562_s4] ss:$0 sm:$0xff]  ;;  %v246_v48 = vld [vmem:[#allocation8] sm:$0xff]  ;;  %v247_v52 = vld [vmem:[#allocation8 + $0x8] sm:$0xff]  ;;  %s257_s21 = sshll.u32 %s439_s3, 4  ;;  %s258_s21 = int_to_ptr.vmem [resolvable:$true] %s257_s21 }
  0x3c   :  { %76 = vadd.xlane.f32.xlu0 %v73_v1  ;;  %v272_v46 = vld [vmem:[%s564_s6] ss:$0 sm:$0xff]  ;;  %s402_s4 = scalar_lea.vmem %s258_s21, 256  ;;  %p407_p11 = scmp.lt.s32.totalorder %s258_s21, %s258_s21 }
  0x3d   :  { %293 = vmatpush3.bf16.msra.mxu0 %v321_v12  ;;  %p403_p10 = scmp.ne.s32.totalorder %s258_s21, %s402_s4  ;;  %p408_p12 = scmp.lt.s32.totalorder %s402_s4, %s402_s4 }
  0x3e   :  { %294 = vmatprep.subr.bf16.mxu0 %v437_v11 }
  0x3f   :  { %p409_p13 = por %p408_p12, %p407_p11 }
  0x41   :  { %295 = vmatpush3.bf16.msra.mxu0 %v322_v13  ;;  %p410_p0 = pnand %p409_p13, %p403_p10 }
  0x42   :  { %296 = vmatprep.subr.bf16.mxu0 %v437_v11 }
  0x45   :  { %297 = vmatpush3.bf16.msra.mxu0 %v323_v14 }
  0x46   :  { %298 = vmatprep.subr.bf16.mxu0 %v437_v11 }
  0x49   :  { %299 = vmatpush3.bf16.msra.mxu0 %v324_v15 }
  0x4a   :  { %300 = vmatprep.subr.bf16.mxu0 %v437_v11 }
  0x4d   :  { %301 = vmatpush3.bf16.msra.mxu0 %v325_v16 }
  0x4e   :  { %302 = vmatprep.subr.bf16.mxu0 %v437_v11 }
  0x51   :  { %303 = vmatpush3.bf16.msra.mxu0 %v326_v17 }
  0x52   :  { %304 = vmatprep.subr.bf16.mxu0 %v437_v11 }
  0x55   :  { %305 = vmatpush3.bf16.msra.mxu0 %v327_v18 }
  0xc5   :  { %v75_v2 = vpop.xlane.xlu0 %74 }
  0xc6   :  { %v79_v3 = vmul.f32 0.0078125, %v75_v2 }
  0xc8   :  { %v529_v4 = vsub.f32 %v72_v0, %v79_v3 }
  0xc9   :  { %v77_v5 = vpop.xlane.xlu0 %76 }
  0xca   :  { %v80_v6 = vmul.f32 0.0078125, %v77_v5  ;;  %v83_v7 = vmul.f32 %v529_v4, %v529_v4 }
  0xcc   :  { %v82_v8 = vsub.f32 %v73_v1, %v80_v6  ;;  %85 = vadd.xlane.f32.xlu1 %v83_v7 }
  0xce   :  { %v84_v9 = vmul.f32 %v82_v8, %v82_v8 }
  0xd0   :  { %87 = vadd.xlane.f32.xlu1 %v84_v9 }
 0x159   :  { %v86_v19 = vpop.xlane.xlu1 %85 }
 0x15a   :  { %v89_v20 = vmul.f32 0.007874016, %v86_v19 }
 0x15c   :  { %328 = vrsqrt.f32 %v89_v20  ;;  %vm93_vm1 = vcmp.eq.f32.partialorder %v89_v20, inf  ;;  %v96_v25 = vand.u32 2147483648, %v89_v20  ;;  %vm95_vm2 = vcmp.eq.f32.partialorder %v89_v20, 0.0 }
 0x15d   :  { %v88_v21 = vpop.xlane.xlu1 %87 }
 0x15e   :  { %v90_v22 = vmul.f32 0.007874016, %v88_v21 }
 0x160   :  { %330 = vrsqrt.f32 %v90_v22  ;;  %vm100_vm3 = vcmp.eq.f32.partialorder %v90_v22, inf  ;;  %v103_v31 = vand.u32 2147483648, %v90_v22  ;;  %vm102_vm4 = vcmp.eq.f32.partialorder %v90_v22, 0.0 }
 0x166   :  { %v329_v23 = vpop.eup %328 }
 0x167   :  { %v92_v24 = vmul.f32 %v329_v23, %v89_v20 }
 0x169   :  { %v94_v26 = vsel %vm93_vm1, %v89_v20, %v92_v24 }
 0x16a   :  { %v331_v27 = vpop.eup %330  ;;  %v97_v28 = vsel %vm95_vm2, %v96_v25, %v94_v26 }
 0x16b   :  { %v105_v29 = vadd.f32 1e-06, %v97_v28  ;;  %v99_v30 = vmul.f32 %v331_v27, %v90_v22 }
 0x16d   :  { %v101_v32 = vsel %vm100_vm3, %v90_v22, %v99_v30  ;;  %332 = vrcp.f32 %v105_v29 }
 0x16e   :  { %v104_v33 = vsel %vm102_vm4, %v103_v31, %v101_v32 }
 0x16f   :  { %v106_v34 = vadd.f32 1e-06, %v104_v33 }
 0x171   :  { %334 = vrcp.f32 %v106_v34 }
 0x177   :  { %v333_v36 = vpop.eup %332 }
 0x178   :  { %v116_v37 = vmul.f32 %v333_v36, %v270_v35 }
 0x17a   :  { %v118_v40 = vmul.f32 %v116_v37, %v529_v4 }
 0x17b   :  { %v335_v38 = vpop.eup %334 }
 0x17c   :  { %v117_v39 = vmul.f32 %v335_v38, %v270_v35  ;;  %v127_v43 = vadd.f32 %v271_v41, %v118_v40 }
 0x17e   :  { %v119_v42 = vmul.f32 %v117_v39, %v82_v8 }
 0x180   :  { %v128_v44 = vadd.f32 %v271_v41, %v119_v42 }
 0x182   :  { %v133_v45 = vpack.c.bf16 %v128_v44, %v127_v43 }
 0x184   :  { %307 = vmatmul.mubr.bf16.vlgmr.msra.gmra.mrb[0].mxu0 %v133_v45 }
 0x257   :  { %v239_v47 = vpop.f32.mrb[0].mxu0 }
 0x258   :  { %v240_v49 = vadd.f32 %v272_v46, %v239_v47  ;;  %v308_v50 = vpop.f32.mrb[1].mxu0 }
 0x259   :  { %v242_v51 = vpop.f32.mrb[2].mxu0 }
 0x25a   :  { %v248_v53 = vadd.f32 %v246_v48, %v240_v49  ;;  %v243_v54 = vadd.f32 %v272_v46, %v242_v51  ;;  %v309_v55 = vpop.f32.mrb[3].mxu0 }
 0x25c   :  { %250 = vst [vmem:[#allocation11] sm:$0xff] %v248_v53  ;;  %v249_v56 = vadd.f32 %v247_v52, %v243_v54 }
 0x25e   :  { %251 = vst [vmem:[#allocation11 + $0x8] sm:$0xff] %v249_v56 }
 0x25f   :  { %413 = shalt.err (!%p410_p0)
}
 0x260   :  { %s414_s0 = scalar_lea.hbm %s565_s7, 256 }
 0x261   :  { %p415_p1 = scmp.ne.s32.totalorder %s565_s7, %s414_s0  ;;  %p418_p2 = scmp.lt.u32.totalorder %s414_s0, %s565_s7 }
 0x263   :  { %p420_p3 = pnand %p418_p2, %p415_p1 }
 0x265   :  { %423 = shalt.err (!%p420_p3)
}
 0x266   :  { %263 = dma.vmem_to_hbm [thread:$0]  %s258_s21, 256, %s565_s7, [#allocation7], %s432_s12, %s432_s12, %s433_s13  }
 0x267   :  { %428 = dma.done.wait [#allocation7], 256  }
 0x268   :  { %429 = vsyncadd [#allocation7], 4294967040 }
 0x269   :  { %267 = vsyncpa [#allocation6], 1 }
 0x26a   :  { %268 = vsyncpa [#allocation9], 1 }
 0x26b   :  { %269 = vsyncpa [#allocation7], 1 }

</bundles_post_ra>
